<compile_context>
chip_gen: v7x
topology: tpu7x:2x2x1
jax: 0.10.0
libtpu: 0.0.40
codegen_flags: <defaults>
</compile_context>

<pallas_src>
import functools

import jax
import jax.numpy as jnp
from jax.experimental import pallas as pl
from jax.experimental.pallas import tpu as pltpu

EPS = 1e-5
LEAKY_SLOPE = 0.02  # nn.LeakyReLU(0.02) in the original module
DEFAULT_TILE_B = 512


def _round_up(n, m):
    return ((n + m - 1) // m) * m


# --------------------------------------------------------------------------
# Kernel
# --------------------------------------------------------------------------
def _nba_kernel(x_ref,
                w1_ref, b1_ref,
                w2_ref, b2_ref,
                w3_ref, b3_ref,
                lng_ref, lnb_ref,
                w4_ref, b4_ref,
                out_ref):
    h = x_ref[...].astype(jnp.float32)

    # layer1 + tanh   (BN0 folded into w1/b1; dropout1 identity in eval)
    h = jnp.tanh(jnp.dot(h, w1_ref[...], preferred_element_type=jnp.float32)
                 + b1_ref[...])

    # layer2 + tanh   (BN1 folded into w2/b2; dropout2 identity)
    h = jnp.tanh(jnp.dot(h, w2_ref[...], preferred_element_type=jnp.float32)
                 + b2_ref[...])

    # layer3 + tanh   (BN2 folded into w3/b3; dropout3 identity)
    h = jnp.tanh(jnp.dot(h, w3_ref[...], preferred_element_type=jnp.float32)
                 + b3_ref[...])

    # BN3 = LayerNorm(25) over the feature axis, per sample
    mu = jnp.mean(h, axis=-1, keepdims=True)
    var = jnp.mean((h - mu) * (h - mu), axis=-1, keepdims=True)
    h = (h - mu) * jax.lax.rsqrt(var + EPS) * lng_ref[...] + lnb_ref[...]

    # layer4 + LeakyReLU(0.02)
    h = jnp.dot(h, w4_ref[...], preferred_element_type=jnp.float32) + b4_ref[...]
    out_ref[...] = jnp.where(h >= 0, h, LEAKY_SLOPE * h).astype(out_ref.dtype)


# --------------------------------------------------------------------------
# Host-side BN folding (eval mode BatchNorm is affine -> compose into Linear)
# --------------------------------------------------------------------------
def _fold_bn_into_linear(gamma, beta, running_mean, running_var, w, b,
                         eps=EPS):
    """Return (w', b') such that  x @ w' + b'  ==  BN_eval(x) @ w + b."""
    scale = gamma / jnp.sqrt(running_var + eps)        # (1, in)
    shift = beta - running_mean * scale                # (1, in)
    w_f = scale.reshape(-1, 1) * w                     # (in, out)
    b_f = shift @ w + b                                # (1, out)
    return w_f, b_f


def _fused_params(params):
    w1, b1 = _fold_bn_into_linear(params["bn0_gamma"], params["bn0_beta"],
                                  params["bn0_mean"], params["bn0_var"],
                                  params["w1"], params["b1"])
    w2, b2 = _fold_bn_into_linear(params["bn1_gamma"], params["bn1_beta"],
                                  params["bn1_mean"], params["bn1_var"],
                                  params["w2"], params["b2"])
    w3, b3 = _fold_bn_into_linear(params["bn2_gamma"], params["bn2_beta"],
                                  params["bn2_mean"], params["bn2_var"],
                                  params["w3"], params["b3"])
    return (w1, b1, w2, b2, w3, b3,
            params["ln_gamma"], params["ln_beta"],
            params["w4"], params["b4"])


# --------------------------------------------------------------------------
# Wrapper
# --------------------------------------------------------------------------
@functools.partial(jax.jit, static_argnames=("tile_b",))
def nba_classifier_forward(x, params, *, tile_b=DEFAULT_TILE_B):
    """x: (B, 51) float32.  params: dict from init_params()."""
    B, F = x.shape
    assert F == 51

    # Choose the batch tile: multiple of 8, at most the (padded) batch.
    tile_b = min(tile_b, _round_up(B, 8))
    tile_b = _round_up(tile_b, 8)
    pad_b = _round_up(B, tile_b)
    if pad_b != B:
        x = jnp.pad(x, ((0, pad_b - B), (0, 0)))

    fused = _fused_params(params)

    # x / out are tiled over the batch; every parameter is a single
    # full-array block with a constant index_map (resident across the grid).
    const_spec = lambda p: pl.BlockSpec(p.shape, lambda i: (0,) * p.ndim)
    in_specs = [pl.BlockSpec((tile_b, F), lambda i: (i, 0))]
    in_specs += [const_spec(p) for p in fused]

    out = pl.pallas_call(
        _nba_kernel,
        out_shape=jax.ShapeDtypeStruct((pad_b, 2), jnp.float32),
        grid_spec=pltpu.PrefetchScalarGridSpec(
            num_scalar_prefetch=0,
            grid=(pad_b // tile_b,),
            in_specs=in_specs,
            out_specs=pl.BlockSpec((tile_b, 2), lambda i: (i, 0)),
        ),
        compiler_params=pltpu.CompilerParams(
            dimension_semantics=("parallel",),   # v7x: shard batch over 2 TCs
        ),
    )(x, *fused)

    return out[:B]


# --------------------------------------------------------------------------
# Parameter init (PyTorch defaults) and pure-JAX reference
# --------------------------------------------------------------------------
def _linear_init(key, fan_in, fan_out):
    """PyTorch nn.Linear default: U(-1/sqrt(fan_in), 1/sqrt(fan_in))."""
    kw, kb = jax.random.split(key)
    bound = 1.0 / jnp.sqrt(jnp.float32(fan_in))
    w = jax.random.uniform(kw, (fan_in, fan_out), jnp.float32, -bound, bound)
    b = jax.random.uniform(kb, (1, fan_out), jnp.float32, -bound, bound)
    return w, b


def init_params(key):
    keys = jax.random.split(key, 4)
    w1, b1 = _linear_init(keys[0], 51, 150)
    w2, b2 = _linear_init(keys[1], 150, 75)
    w3, b3 = _linear_init(keys[2], 75, 25)
    w4, b4 = _linear_init(keys[3], 25, 2)
    ones = lambda n: jnp.ones((1, n), jnp.float32)
    zeros = lambda n: jnp.zeros((1, n), jnp.float32)
    return {
        "w1": w1, "b1": b1, "w2": w2, "b2": b2,
        "w3": w3, "b3": b3, "w4": w4, "b4": b4,
        # BatchNorm affine params + running stats (fresh init -> mean 0, var 1)
        "bn0_gamma": ones(51),  "bn0_beta": zeros(51),
        "bn0_mean": zeros(51),  "bn0_var": ones(51),
        "bn1_gamma": ones(150), "bn1_beta": zeros(150),
        "bn1_mean": zeros(150), "bn1_var": ones(150),
        "bn2_gamma": ones(75),  "bn2_beta": zeros(75),
        "bn2_mean": zeros(75),  "bn2_var": ones(75),
        # LayerNorm affine params
        "ln_gamma": ones(25),   "ln_beta": zeros(25),
    }


def _reference_forward(x, p):
    """Pure-JAX reference with un-fused eval-mode BN, for sanity checking."""
    def bn(h, g, b, m, v):
        return (h - m) / jnp.sqrt(v + EPS) * g + b

    h = bn(x, p["bn0_gamma"], p["bn0_beta"], p["bn0_mean"], p["bn0_var"])
    h = jnp.tanh(h @ p["w1"] + p["b1"])
    h = bn(h, p["bn1_gamma"], p["bn1_beta"], p["bn1_mean"], p["bn1_var"])
    h = jnp.tanh(h @ p["w2"] + p["b2"])
    h = bn(h, p["bn2_gamma"], p["bn2_beta"], p["bn2_mean"], p["bn2_var"])
    h = jnp.tanh(h @ p["w3"] + p["b3"])
    mu = jnp.mean(h, axis=-1, keepdims=True)
    var = jnp.mean((h - mu) ** 2, axis=-1, keepdims=True)
    h = (h - mu) / jnp.sqrt(var + EPS) * p["ln_gamma"] + p["ln_beta"]
    h = h @ p["w4"] + p["b4"]
    return jnp.where(h >= 0, h, LEAKY_SLOPE * h)


if __name__ == "__main__":
    key = jax.random.PRNGKey(0)
    k_params, k_x = jax.random.split(key)
    params = init_params(k_params)

    # Small shape consistent with the module: batch=8, 51 features.
    B = 8
    x = jax.random.normal(k_x, (B, 51), jnp.float32)

    out = nba_classifier_forward(x, params)
    out = jax.block_until_ready(out)

    ref = _reference_forward(x, params)
    assert out.shape == (B, 2)
    assert jnp.allclose(out, ref, atol=1e-5, rtol=1e-5)

    # Also exercise the tiled / ragged path (B not a multiple of the tile).
    B2 = 1000
    x2 = jax.random.normal(jax.random.PRNGKey(1), (B2, 51), jnp.float32)
    out2 = jax.block_until_ready(
        nba_classifier_forward(x2, params, tile_b=256))
    ref2 = _reference_forward(x2, params)
    assert out2.shape == (B2, 2)
    assert jnp.allclose(out2, ref2, atol=1e-5, rtol=1e-5)

    print("KERNEL_OK")
</pallas_src>

<mosaic_0001>
module attributes {stable_mosaic.version = 11 : i64} {
  func.func @_nba_kernel(%arg0: i32, %arg1: memref<8x51xf32, #tpu.memory_space<vmem>>, %arg2: memref<51x150xf32, #tpu.memory_space<vmem>>, %arg3: memref<1x150xf32, #tpu.memory_space<vmem>>, %arg4: memref<150x75xf32, #tpu.memory_space<vmem>>, %arg5: memref<1x75xf32, #tpu.memory_space<vmem>>, %arg6: memref<75x25xf32, #tpu.memory_space<vmem>>, %arg7: memref<1x25xf32, #tpu.memory_space<vmem>>, %arg8: memref<1x25xf32, #tpu.memory_space<vmem>>, %arg9: memref<1x25xf32, #tpu.memory_space<vmem>>, %arg10: memref<25x2xf32, #tpu.memory_space<vmem>>, %arg11: memref<1x2xf32, #tpu.memory_space<vmem>>, %arg12: memref<8x2xf32, #tpu.memory_space<vmem>>) attributes {dimension_semantics = [#tpu.dimension_semantics<parallel>], iteration_bounds = array<i64: 1>, scalar_prefetch = 0 : i64, scratch_operands = 0 : i64, tpu.core_type = #tpu.core_type<tc>, window_params = [{transform_indices = @transform_0, window_bounds = array<i64: 8, 51>}, {pipeline_mode = #tpu.pipeline_mode<synchronous>, transform_indices = @transform_1, window_bounds = array<i64: 51, 150>}, {pipeline_mode = #tpu.pipeline_mode<synchronous>, transform_indices = @transform_2, window_bounds = array<i64: 1, 150>}, {pipeline_mode = #tpu.pipeline_mode<synchronous>, transform_indices = @transform_3, window_bounds = array<i64: 150, 75>}, {pipeline_mode = #tpu.pipeline_mode<synchronous>, transform_indices = @transform_4, window_bounds = array<i64: 1, 75>}, {pipeline_mode = #tpu.pipeline_mode<synchronous>, transform_indices = @transform_5, window_bounds = array<i64: 75, 25>}, {pipeline_mode = #tpu.pipeline_mode<synchronous>, transform_indices = @transform_6, window_bounds = array<i64: 1, 25>}, {pipeline_mode = #tpu.pipeline_mode<synchronous>, transform_indices = @transform_7, window_bounds = array<i64: 1, 25>}, {pipeline_mode = #tpu.pipeline_mode<synchronous>, transform_indices = @transform_8, window_bounds = array<i64: 1, 25>}, {pipeline_mode = #tpu.pipeline_mode<synchronous>, transform_indices = @transform_9, window_bounds = array<i64: 25, 2>}, {pipeline_mode = #tpu.pipeline_mode<synchronous>, transform_indices = @transform_10, window_bounds = array<i64: 1, 2>}, {transform_indices = @transform_11, window_bounds = array<i64: 8, 2>}]} {
    %c0 = arith.constant 0 : index
    %c0_0 = arith.constant 0 : index
    %0 = vector.load %arg1[%c0, %c0_0] : memref<8x51xf32, #tpu.memory_space<vmem>>, vector<8x51xf32>
    %c0_1 = arith.constant 0 : index
    %c0_2 = arith.constant 0 : index
    %1 = vector.load %arg2[%c0_1, %c0_2] : memref<51x150xf32, #tpu.memory_space<vmem>>, vector<51x150xf32>
    %cst = arith.constant dense<0.000000e+00> : vector<8x150xf32>
    %2 = tpu.matmul %0, %1, %cst {dimension_numbers = #tpu.dot_dimension_numbers<[1], [0], [0], [1], [0, 0, 1, 1], [], []>} : vector<8x51xf32>, vector<51x150xf32>, vector<8x150xf32> -> vector<8x150xf32>
    %c0_3 = arith.constant 0 : index
    %c0_4 = arith.constant 0 : index
    %3 = vector.load %arg3[%c0_3, %c0_4] : memref<1x150xf32, #tpu.memory_space<vmem>>, vector<1x150xf32>
    %4 = vector.broadcast %3 : vector<1x150xf32> to vector<8x150xf32>
    %5 = arith.addf %2, %4 : vector<8x150xf32>
    %6 = math.tanh %5 : vector<8x150xf32>
    %c0_5 = arith.constant 0 : index
    %c0_6 = arith.constant 0 : index
    %7 = vector.load %arg4[%c0_5, %c0_6] : memref<150x75xf32, #tpu.memory_space<vmem>>, vector<150x75xf32>
    %cst_7 = arith.constant dense<0.000000e+00> : vector<8x75xf32>
    %8 = tpu.matmul %6, %7, %cst_7 {dimension_numbers = #tpu.dot_dimension_numbers<[1], [0], [0], [1], [0, 0, 1, 1], [], []>} : vector<8x150xf32>, vector<150x75xf32>, vector<8x75xf32> -> vector<8x75xf32>
    %c0_8 = arith.constant 0 : index
    %c0_9 = arith.constant 0 : index
    %9 = vector.load %arg5[%c0_8, %c0_9] : memref<1x75xf32, #tpu.memory_space<vmem>>, vector<1x75xf32>
    %10 = vector.broadcast %9 : vector<1x75xf32> to vector<8x75xf32>
    %11 = arith.addf %8, %10 : vector<8x75xf32>
    %12 = math.tanh %11 : vector<8x75xf32>
    %c0_10 = arith.constant 0 : index
    %c0_11 = arith.constant 0 : index
    %13 = vector.load %arg6[%c0_10, %c0_11] : memref<75x25xf32, #tpu.memory_space<vmem>>, vector<75x25xf32>
    %cst_12 = arith.constant dense<0.000000e+00> : vector<8x25xf32>
    %14 = tpu.matmul %12, %13, %cst_12 {dimension_numbers = #tpu.dot_dimension_numbers<[1], [0], [0], [1], [0, 0, 1, 1], [], []>} : vector<8x75xf32>, vector<75x25xf32>, vector<8x25xf32> -> vector<8x25xf32>
    %c0_13 = arith.constant 0 : index
    %c0_14 = arith.constant 0 : index
    %15 = vector.load %arg7[%c0_13, %c0_14] : memref<1x25xf32, #tpu.memory_space<vmem>>, vector<1x25xf32>
    %16 = vector.broadcast %15 : vector<1x25xf32> to vector<8x25xf32>
    %17 = arith.addf %14, %16 : vector<8x25xf32>
    %18 = math.tanh %17 : vector<8x25xf32>
    %cst_15 = arith.constant dense<0.000000e+00> : vector<8xf32>
    %19 = vector.multi_reduction <add>, %18, %cst_15 [1] : vector<8x25xf32> to vector<8xf32>
    %20 = vector.shape_cast %19 : vector<8xf32> to vector<8x1xf32>
    %cst_16 = arith.constant 2.500000e+01 : f32
    %21 = vector.broadcast %cst_16 : f32 to vector<8x1xf32>
    %22 = arith.divf %20, %21 : vector<8x1xf32>
    %23 = vector.broadcast %22 : vector<8x1xf32> to vector<8x25xf32>
    %24 = arith.subf %18, %23 : vector<8x25xf32>
    %25 = vector.broadcast %22 : vector<8x1xf32> to vector<8x25xf32>
    %26 = arith.subf %18, %25 : vector<8x25xf32>
    %27 = arith.mulf %24, %26 : vector<8x25xf32>
    %cst_17 = arith.constant dense<0.000000e+00> : vector<8xf32>
    %28 = vector.multi_reduction <add>, %27, %cst_17 [1] : vector<8x25xf32> to vector<8xf32>
    %29 = vector.shape_cast %28 : vector<8xf32> to vector<8x1xf32>
    %cst_18 = arith.constant 2.500000e+01 : f32
    %30 = vector.broadcast %cst_18 : f32 to vector<8x1xf32>
    %31 = arith.divf %29, %30 : vector<8x1xf32>
    %32 = vector.broadcast %22 : vector<8x1xf32> to vector<8x25xf32>
    %33 = arith.subf %18, %32 : vector<8x25xf32>
    %cst_19 = arith.constant 9.99999974E-6 : f32
    %34 = vector.broadcast %cst_19 : f32 to vector<8x1xf32>
    %35 = arith.addf %31, %34 : vector<8x1xf32>
    %36 = math.rsqrt %35 : vector<8x1xf32>
    %37 = vector.broadcast %36 : vector<8x1xf32> to vector<8x25xf32>
    %38 = arith.mulf %33, %37 : vector<8x25xf32>
    %c0_20 = arith.constant 0 : index
    %c0_21 = arith.constant 0 : index
    %39 = vector.load %arg8[%c0_20, %c0_21] : memref<1x25xf32, #tpu.memory_space<vmem>>, vector<1x25xf32>
    %40 = vector.broadcast %39 : vector<1x25xf32> to vector<8x25xf32>
    %41 = arith.mulf %38, %40 : vector<8x25xf32>
    %c0_22 = arith.constant 0 : index
    %c0_23 = arith.constant 0 : index
    %42 = vector.load %arg9[%c0_22, %c0_23] : memref<1x25xf32, #tpu.memory_space<vmem>>, vector<1x25xf32>
    %43 = vector.broadcast %42 : vector<1x25xf32> to vector<8x25xf32>
    %44 = arith.addf %41, %43 : vector<8x25xf32>
    %c0_24 = arith.constant 0 : index
    %c0_25 = arith.constant 0 : index
    %45 = vector.load %arg10[%c0_24, %c0_25] : memref<25x2xf32, #tpu.memory_space<vmem>>, vector<25x2xf32>
    %cst_26 = arith.constant dense<0.000000e+00> : vector<8x2xf32>
    %46 = tpu.matmul %44, %45, %cst_26 {dimension_numbers = #tpu.dot_dimension_numbers<[1], [0], [0], [1], [0, 0, 1, 1], [], []>} : vector<8x25xf32>, vector<25x2xf32>, vector<8x2xf32> -> vector<8x2xf32>
    %c0_27 = arith.constant 0 : index
    %c0_28 = arith.constant 0 : index
    %47 = vector.load %arg11[%c0_27, %c0_28] : memref<1x2xf32, #tpu.memory_space<vmem>>, vector<1x2xf32>
    %48 = vector.broadcast %47 : vector<1x2xf32> to vector<8x2xf32>
    %49 = arith.addf %46, %48 : vector<8x2xf32>
    %cst_29 = arith.constant 0.000000e+00 : f32
    %50 = vector.broadcast %cst_29 : f32 to vector<8x2xf32>
    %51 = arith.cmpf oge, %49, %50 : vector<8x2xf32>
    %cst_30 = arith.constant 2.000000e-02 : f32
    %52 = vector.broadcast %cst_30 : f32 to vector<8x2xf32>
    %53 = arith.mulf %52, %49 : vector<8x2xf32>
    %54 = arith.select %51, %49, %53 : vector<8x2xi1>, vector<8x2xf32>
    %c0_31 = arith.constant 0 : index
    %c0_32 = arith.constant 0 : index
    %55 = vector.load %arg12[%c0_31, %c0_32] : memref<8x2xf32, #tpu.memory_space<vmem>>, vector<8x2xf32>
    tpu.vector_store %arg12[%c0_31, %c0_32], %54 {strides = array<i32>} : memref<8x2xf32, #tpu.memory_space<vmem>>, vector<8x2xf32>,
    return
  }
  func.func @transform_0(%arg0: i32) -> (i32, i32) {
    %c0_i32 = arith.constant 0 : i32
    %c0_i32_0 = arith.constant 0 : i32
    return %arg0, %c0_i32 : i32, i32
  }
  func.func @transform_1(%arg0: i32) -> (i32, i32) {
    %c0_i32 = arith.constant 0 : i32
    %c0_i32_0 = arith.constant 0 : i32
    %c0_i32_1 = arith.constant 0 : i32
    return %c0_i32, %c0_i32_0 : i32, i32
  }
  func.func @transform_2(%arg0: i32) -> (i32, i32) {
    %c0_i32 = arith.constant 0 : i32
    %c0_i32_0 = arith.constant 0 : i32
    %c0_i32_1 = arith.constant 0 : i32
    return %c0_i32, %c0_i32_0 : i32, i32
  }
  func.func @transform_3(%arg0: i32) -> (i32, i32) {
    %c0_i32 = arith.constant 0 : i32
    %c0_i32_0 = arith.constant 0 : i32
    %c0_i32_1 = arith.constant 0 : i32
    return %c0_i32, %c0_i32_0 : i32, i32
  }
  func.func @transform_4(%arg0: i32) -> (i32, i32) {
    %c0_i32 = arith.constant 0 : i32
    %c0_i32_0 = arith.constant 0 : i32
    %c0_i32_1 = arith.constant 0 : i32
    return %c0_i32, %c0_i32_0 : i32, i32
  }
  func.func @transform_5(%arg0: i32) -> (i32, i32) {
    %c0_i32 = arith.constant 0 : i32
    %c0_i32_0 = arith.constant 0 : i32
    %c0_i32_1 = arith.constant 0 : i32
    return %c0_i32, %c0_i32_0 : i32, i32
  }
  func.func @transform_6(%arg0: i32) -> (i32, i32) {
    %c0_i32 = arith.constant 0 : i32
    %c0_i32_0 = arith.constant 0 : i32
    %c0_i32_1 = arith.constant 0 : i32
    return %c0_i32, %c0_i32_0 : i32, i32
  }
  func.func @transform_7(%arg0: i32) -> (i32, i32) {
    %c0_i32 = arith.constant 0 : i32
    %c0_i32_0 = arith.constant 0 : i32
    %c0_i32_1 = arith.constant 0 : i32
    return %c0_i32, %c0_i32_0 : i32, i32
  }
  func.func @transform_8(%arg0: i32) -> (i32, i32) {
    %c0_i32 = arith.constant 0 : i32
    %c0_i32_0 = arith.constant 0 : i32
    %c0_i32_1 = arith.constant 0 : i32
    return %c0_i32, %c0_i32_0 : i32, i32
  }
  func.func @transform_9(%arg0: i32) -> (i32, i32) {
    %c0_i32 = arith.constant 0 : i32
    %c0_i32_0 = arith.constant 0 : i32
    %c0_i32_1 = arith.constant 0 : i32
    return %c0_i32, %c0_i32_0 : i32, i32
  }
  func.func @transform_10(%arg0: i32) -> (i32, i32) {
    %c0_i32 = arith.constant 0 : i32
    %c0_i32_0 = arith.constant 0 : i32
    %c0_i32_1 = arith.constant 0 : i32
    return %c0_i32, %c0_i32_0 : i32, i32
  }
  func.func @transform_11(%arg0: i32) -> (i32, i32) {
    %c0_i32 = arith.constant 0 : i32
    %c0_i32_0 = arith.constant 0 : i32
    return %arg0, %c0_i32 : i32, i32
  }
}

</mosaic_0001>

<bundles_post_ra>
// kernel: nba_classifier_forward.1
= control target key start
LH: loop header
LB: loop body
LE: loop exit
PB: predicated region body
PF: predicated region fallthrough
CT: control target
= control target key end

     0   :  { %v617_v3 = vmov 0.0   ;;  %v618_v4 = vmov 0.0|0.0   ;;  %vm69_vm0 = vcmask 1042432   ;;  %vm65_vm1 = vcmask 416768   ;;  %s876_s1 = inlined_call_operand.vmem [shape: f32[51,150], index: 1, kind: input, shape index: {}]   ;;  %s877_s3 = inlined_call_operand.vmem [shape: f32[150,75], index: 3, kind: input, shape index: {}]   ;;  %s878_s0 = inlined_call_operand.vmem [shape: f32[8,51], index: 0, kind: input, shape index: {}]   ;;  %s879_s5 = inlined_call_operand.vmem [shape: f32[75,25], index: 5, kind: input, shape index: {}]   ;;  %s880_s2 = inlined_call_operand.vmem [shape: f32[1,150], index: 2, kind: input, shape index: {}]   ;;  %s881_s4 = inlined_call_operand.vmem [shape: f32[1,75], index: 4, kind: input, shape index: {}]   ;;  %s882_s6 = inlined_call_operand.vmem [shape: f32[1,25], index: 6, kind: input, shape index: {}]   ;;  %s883_s9 = inlined_call_operand.vmem [shape: f32[25,2], index: 9, kind: input, shape index: {}]   ;;  %s884_s7 = inlined_call_operand.vmem [shape: f32[1,25], index: 7, kind: input, shape index: {}]   ;;  %s885_s8 = inlined_call_operand.vmem [shape: f32[1,25], index: 8, kind: input, shape index: {}]   ;;  %s886_s10 = inlined_call_operand.vmem [shape: f32[1,2], index: 10, kind: input, shape index: {}]   ;;  %s887_s11 = inlined_call_operand.vmem [shape: f32[8,2], index: 11, kind: output, shape index: {}]  }
   0x1   :  { %v40_v0 = vld [vmem:[%s876_s1 + $0x8] sm:$0xff]  ;;  %v42_v1 = vld [vmem:[%s876_s1 + $0x18] sm:$0xff]  ;;  %v39_v2 = vld [vmem:[%s876_s1] sm:$0xff]  ;;  %140 = vmatprep.mubr.f32.mxu0 %v617_v3  ;;  %553 = vmatprep.subr.bf16.mxu1 %v618_v4  ;;  %vm179_vm2 = vcmask 1045504   ;;  %v55_v57 = vlaneseq  ;;  %vm175_vm3 = vcmask 179200   ;;  %vm619_vm4 = vmmov 0  }
   0x2   :  { %v541_v5 = vpack.c.bf16 %v42_v1, %v40_v0  ;;  %v41_v6 = vld [vmem:[%s876_s1 + $0x10] sm:$0xff]  ;;  %v44_v7 = vld [vmem:[%s876_s1 + $0x28] sm:$0xff]  ;;  %v46_v8 = vld [vmem:[%s876_s1 + $0x38] sm:$0xff]  ;;  %vm620_vm5 = vmmov 1   ;;  %vm271_vm7 = vcmask 613376   ;;  %vm349_vm8 = vcmask 203776  }
   0x3   :  { %v543_v9 = vpack.c.bf16 %v41_v6, %v39_v2  ;;  %v545_v10 = vpack.c.bf16 %v46_v8, %v44_v7  ;;  %v43_v11 = vld [vmem:[%s876_s1 + $0x20] sm:$0xff]  ;;  %v45_v12 = vld [vmem:[%s876_s1 + $0x30] sm:$0xff]  ;;  %v48_v13 = vld [vmem:[%s876_s1 + $0x48] sm:$0xff]  ;;  %v56_v58 = vshrl.u32 %v55_v57, 7  ;;  %vm394_vm9 = vcmask 1040384  }
   0x4   :  { %542 = vmatprep.subr.bf16.mxu0 %v541_v5  ;;  %v50_v14 = vld [vmem:[%s876_s1 + $0x58] sm:$0xff]  ;;  %v547_v15 = vpack.c.bf16 %v45_v12, %v43_v11  ;;  %v47_v16 = vld [vmem:[%s876_s1 + $0x40] sm:$0xff]  ;;  %v49_v17 = vld [vmem:[%s876_s1 + $0x50] sm:$0xff]  ;;  %vm471_vm12 = vcmask 15360  }
   0x5   :  { %544 = vmatpush1.bf16.msra.mxu0 %v543_v9  ;;  %v549_v18 = vpack.c.bf16 %v50_v14, %v48_v13  ;;  %v149_v19 = vld [vmem:[%s877_s3] sm:$0xff]  ;;  %v150_v20 = vld [vmem:[%s877_s3 + $0x8] sm:$0xff]  ;;  %v151_v21 = vld [vmem:[%s877_s3 + $0x10] sm:$0xff]  ;;  %v551_v24 = vpack.c.bf16 %v49_v17, %v47_v16  ;;  %v57_v59 = vsub.s32 0, %v56_v58  ;;  %v61_v61 = vsub.s32 1, %v56_v58 }
   0x6   :  { %546 = vmatprep.subr.bf16.mxu0 %v545_v10  ;;  %v554_v22 = vpack.c.bf16 %v150_v20, %v149_v19  ;;  %v152_v23 = vld [vmem:[%s877_s3 + $0x18] sm:$0xff]  ;;  %v153_v26 = vld [vmem:[%s877_s3 + $0x20] sm:$0xff]  ;;  %v154_v27 = vld [vmem:[%s877_s3 + $0x28] sm:$0xff] }
   0x7   :  { %v557_v25 = vpack.c.bf16 %v152_v23, %v151_v21  ;;  %v52_v28 = vld [vmem:[%s876_s1 + $0x68] sm:$0x7]  ;;  %v560_v29 = vpack.c.bf16 %v154_v27, %v153_v26  ;;  %v51_v30 = vld [vmem:[%s876_s1 + $0x60] sm:$0x7]  ;;  %v155_v31 = vld [vmem:[%s877_s3 + $0x30] sm:$0xff] }
   0x8   :  { %555 = vmatpush1.bf16.msra.mxu1 %v554_v22  ;;  %v156_v32 = vld [vmem:[%s877_s3 + $0x38] sm:$0xff]  ;;  %v38_v33 = vld [vmem:[%s878_s0] sm:$0xff]  ;;  %v158_v36 = vld [vmem:[%s877_s3 + $0x48] sm:$0xff] }
   0x9   :  { %548 = vmatpush1.bf16.msra.mxu0 %v547_v15  ;;  %556 = vmatprep.subr.bf16.mxu1 %v618_v4  ;;  %v563_v34 = vpack.c.bf16 %v156_v32, %v155_v31  ;;  %v157_v35 = vld [vmem:[%s877_s3 + $0x40] sm:$0xff]  ;;  %v159_v38 = vld [vmem:[%s877_s3 + $0x50] sm:$0xff]  ;;  %v160_v39 = vld [vmem:[%s877_s3 + $0x58] sm:$0xff] }
   0xa   :  { %550 = vmatprep.subr.bf16.mxu0 %v549_v18  ;;  %v566_v37 = vpack.c.bf16 %v158_v36, %v157_v35  ;;  %v569_v40 = vpack.c.bf16 %v160_v39, %v159_v38  ;;  %v161_v41 = vld [vmem:[%s877_s3 + $0x60] sm:$0xff]  ;;  %v162_v42 = vld [vmem:[%s877_s3 + $0x68] sm:$0xff]  ;;  %v163_v44 = vld [vmem:[%s877_s3 + $0x70] sm:$0xff] }
   0xb   :  { %v572_v43 = vpack.c.bf16 %v162_v42, %v161_v41  ;;  %v164_v45 = vld [vmem:[%s877_s3 + $0x78] sm:$0xff]  ;;  %v165_v46 = vld [vmem:[%s877_s3 + $0x80] sm:$0xff]  ;;  %v166_v48 = vld [vmem:[%s877_s3 + $0x88] sm:$0xff] }
   0xc   :  { %558 = vmatpush1.bf16.msra.mxu1 %v557_v25  ;;  %v575_v47 = vpack.c.bf16 %v164_v45, %v163_v44  ;;  %v578_v49 = vpack.c.bf16 %v166_v48, %v165_v46  ;;  %v167_v50 = vld [vmem:[%s877_s3 + $0x90] sm:$0x3f]  ;;  %v254_v51 = vld [vmem:[%s879_s5] sm:$0xff]  ;;  %v255_v52 = vld [vmem:[%s879_s5 + $0x8] sm:$0xff] }
   0xd   :  { %552 = vmatpush1.bf16.msra.mxu0 %v551_v24  ;;  %559 = vmatprep.subr.bf16.mxu1 %v618_v4  ;;  %v256_v53 = vld [vmem:[%s879_s5 + $0x10] sm:$0xff]  ;;  %v581_v54 = vpack.c.bf16 %v255_v52, %v254_v51  ;;  %v257_v55 = vld [vmem:[%s879_s5 + $0x18] sm:$0xff]  ;;  %v53_v60 = vld [vmem:[%s880_s2] sm:$0x3] }
   0xe   :  { %477 = vmatprep.subr.msk.mxu0 %vm69_vm0, %v52_v28  ;;  %v584_v56 = vpack.c.bf16 %v257_v55, %v256_v53  ;;  %v58_v62 = vrot.slane %v53_v60, %v57_v59  ;;  %v62_v63 = vrot.slane %v53_v60, %v61_v61  ;;  %v258_v8 = vld [vmem:[%s879_s5 + $0x20] sm:$0xff]  ;;  %v259_v9 = vld [vmem:[%s879_s5 + $0x28] sm:$0xff]  ;;  %v260_v11 = vld [vmem:[%s879_s5 + $0x30] sm:$0xff] }
   0xf   :  { %v587_v10 = vpack.c.bf16 %v259_v9, %v258_v8  ;;  %v261_v12 = vld [vmem:[%s879_s5 + $0x38] sm:$0xff]  ;;  %v262_v14 = vld [vmem:[%s879_s5 + $0x40] sm:$0xff]  ;;  %v263_v15 = vld [vmem:[%s879_s5 + $0x48] sm:$0x7] }
  0x10   :  { %561 = vmatpush1.bf16.msra.mxu1 %v560_v29  ;;  %v590_v13 = vpack.c.bf16 %v261_v12, %v260_v11  ;;  %v593_v16 = vpack.c.bf16 %v263_v15, %v262_v14  ;;  %vm594_vm6 = vmpackc.low %vm69_vm0, %vm620_vm5  ;;  %v480_v17 = vld [vmem:[%s881_s4] ss:$0 sm:$0xff]  ;;  %v382_v35 = vld [vmem:[%s883_s9 + $0x10] sm:$0xff] }
  0x11   :  { %478 = vmatpush1.msk.msra.mxu0 %vm69_vm0, %v51_v30  ;;  %562 = vmatprep.subr.bf16.mxu1 %v618_v4  ;;  %v483_v22 = vld [vmem:[%s882_s6] ss:$0 sm:$0xff]  ;;  %v383_v36 = vld [vmem:[%s883_s9 + $0x18] sm:$0x1]  ;;  %vm601_vm10 = vmpackc.low %vm394_vm9, %vm620_vm5 }
  0x12   :  { %479 = vmatmul.mubr.msk.f32.vlgmr.msra.gmra.mrb[0].mxu0 %vm65_vm1, %v38_v33  ;;  %580 = vmatprep.subr.bf16.mxu0 %v618_v4  ;;  %v381_v33 = vld [vmem:[%s883_s9 + $0x8] sm:$0xff]  ;;  %v488_v46 = vld [vmem:[%s886_s10] ss:$0 sm:$0xff] }
  0x13   :  { %582 = vmatpush3.bf16.msra.mxu0 %v581_v54  ;;  %527 = vmatprep.mubr.msk.f32.mxu0 %vm619_vm4, %v617_v3 }
  0x14   :  { %564 = vmatpush1.bf16.msra.mxu1 %v563_v34  ;;  %583 = vmatprep.subr.bf16.mxu0 %v618_v4 }
  0x15   :  { %565 = vmatprep.subr.bf16.mxu1 %v618_v4 }
  0x17   :  { %585 = vmatpush3.bf16.msra.mxu0 %v584_v56 }
  0x18   :  { %567 = vmatpush1.bf16.msra.mxu1 %v566_v37  ;;  %586 = vmatprep.subr.bf16.mxu0 %v618_v4  ;;  %v600_v37 = vpack.c.bf16 %v383_v36, %v382_v35 }
  0x19   :  { %568 = vmatprep.subr.bf16.mxu1 %v618_v4 }
  0x1b   :  { %588 = vmatpush3.bf16.msra.mxu0 %v587_v10 }
  0x1c   :  { %570 = vmatpush1.bf16.msra.mxu1 %v569_v40  ;;  %589 = vmatprep.subr.bf16.mxu0 %v618_v4 }
  0x1d   :  { %571 = vmatprep.subr.bf16.mxu1 %v618_v4 }
  0x1f   :  { %591 = vmatpush3.bf16.msra.mxu0 %v590_v13 }
  0x20   :  { %573 = vmatpush1.bf16.msra.mxu1 %v572_v43  ;;  %592 = vmatprep.subr.bf16.mxu0 %v618_v4  ;;  %v487_v43 = vld [vmem:[%s885_s8] ss:$0 sm:$0xff] }
  0x21   :  { %574 = vmatprep.subr.bf16.mxu1 %v618_v4 }
  0x23   :  { %595 = vmatpush3.bf16.msk.msra.mxu0 %vm594_vm6, %v593_v16 }
  0x24   :  { %576 = vmatpush1.bf16.msra.mxu1 %v575_v47  ;;  %596 = vmatprep.subr.bf16.mxu0 %v618_v4 }
  0x25   :  { %577 = vmatprep.subr.bf16.mxu1 %v618_v4 }
  0x28   :  { %579 = vmatpush1.bf16.msra.mxu1 %v578_v49 }
  0x29   :  { %219 = vmatprep.subr.mxu1 %v617_v3 }
  0x2c   :  { %481 = vmatpush1.msk.msra.mxu1 %vm179_vm2, %v167_v50 }
  0xe5   :  { %v142_v0 = vpop.f32.mrb[0].mxu0 }
  0xe6   :  { %v143_v1 = vadd.f32 %v142_v0, %v58_v62  ;;  %v144_v2 = vpop.f32.mrb[1].mxu0 }
  0xe7   :  { %v145_v5 = vadd.f32 %v144_v2, %v62_v63 }
  0xe9   :  { %607 = vtanh.f32 %v145_v5 }
  0xea   :  { %609 = vtanh.f32 %v143_v1 }
  0xf3   :  { %v608_v6 = vpop.eup %607 }
  0xf4   :  { %v610_v7 = vpop.eup %609  ;;  %482 = vmatprep.mubr.msk.f32.mxu1 %vm175_vm3, %v608_v6 }
  0xf5   :  { %248 = vmatmul.mubr.f32.vlgmr.msra.gmra.mrb[0].mxu1 %v610_v7 }
 0x1c8   :  { %v249_v18 = vpop.f32.mrb[0].mxu1 }
 0x1c9   :  { %v250_v19 = vadd.f32 %v480_v17, %v249_v18  ;;  %v251_v20 = vpop.f32.mrb[1].mxu1 }
 0x1cb   :  { %611 = vtanh.f32 %v250_v19 }
 0x1d5   :  { %v612_v21 = vpop.eup %611 }
 0x1d6   :  { %528 = vmatmul.mubr.msk.f32.vlgmr.msra.gmra.mrb[2].mxu0 %vm271_vm7, %v612_v21 }
 0x1d7   :  { %538 = vmatprep.mubr.msk.f32.mxu0 %vm619_vm4, %v617_v3  ;;  %v380_v3 = vld [vmem:[%s883_s9] sm:$0xff] }
 0x1d8   :  { %v597_v34 = vpack.c.bf16 %v381_v33, %v380_v3 }
 0x1da   :  { %598 = vmatpush3.bf16.msra.mxu0 %v597_v34 }
 0x1db   :  { %599 = vmatprep.subr.bf16.mxu0 %v618_v4  ;;  %v486_v4 = vld [vmem:[%s884_s7] ss:$0 sm:$0xff] }
 0x1de   :  { %602 = vmatpush3.bf16.msk.msra.mxu0 %vm601_vm10, %v600_v37 }
 0x2a9   :  { %v344_v23 = vpop.f32.mrb[2].mxu0 }
 0x2aa   :  { %v345_v24 = vadd.f32 %v483_v22, %v344_v23  ;;  %v529_v25 = vpop.f32.mrb[3].mxu0 }
 0x2ac   :  { %613 = vtanh.f32 %v345_v24 }
 0x2b6   :  { %v614_v26 = vpop.eup %613 }
 0x2b7   :  { %v350_v27 = vsel %vm349_vm8, %v614_v26, 0.0 }
 0x2b8   :  { %351 = vadd.xlane.f32.xlu0 %v350_v27 }
 0x345   :  { %v352_v28 = vpop.xlane.xlu0 %351 }
 0x346   :  { %v354_v29 = vmul.f32 0.04, %v352_v28 }
 0x348   :  { %v355_v30 = vsub.f32 %v614_v26, %v354_v29 }
 0x34a   :  { %v356_v31 = vmul.f32 %v355_v30, %v355_v30 }
 0x34c   :  { %v357_v32 = vsel %vm349_vm8, %v356_v31, 0.0 }
 0x34d   :  { %358 = vadd.xlane.f32.xlu0 %v357_v32 }
 0x3da   :  { %v359_v38 = vpop.xlane.xlu0 %358 }
 0x3db   :  { %v360_v39 = vmul.f32 0.04, %v359_v38 }
 0x3dd   :  { %v361_v40 = vadd.f32 1e-05, %v360_v39 }
 0x3df   :  { %615 = vrsqrt.f32 %v361_v40 }
 0x3e9   :  { %v616_v41 = vpop.eup %615 }
 0x3ea   :  { %v363_v42 = vmul.f32 %v616_v41, %v355_v30 }
 0x3ec   :  { %v371_v44 = vmul.f32 %v486_v4, %v363_v42 }
 0x3ee   :  { %v379_v45 = vadd.f32 %v487_v43, %v371_v44 }
 0x3f0   :  { %539 = vmatmul.mubr.msk.f32.vlgmr.msra.gmra.mrb[4].mxu0 %vm349_vm8, %v379_v45 }
 0x4c3   :  { %v464_v47 = vpop.f32.mrb[4].mxu0 }
 0x4c4   :  { %v465_v48 = vadd.f32 %v488_v46, %v464_v47  ;;  %v540_v49 = vpop.f32.mrb[5].mxu0 }
 0x4c6   :  { %vm468_vm11 = vcmp.ge.f32.partialorder %v465_v48, 0.0  ;;  %v469_v50 = vmul.f32 0.02, %v465_v48 }
 0x4c8   :  { %v470_v51 = vsel %vm468_vm11, %v465_v48, %v469_v50 }
 0x4c9   :  { %472 = vst.msk [vmem:[%s887_s11] sm:$0xff] %vm471_vm12, %v470_v51 }

</bundles_post_ra>
